<compile_context>
chip_gen: v6e
topology: v6e:2x2x1
jax: 0.10.0
libtpu: 0.0.40
codegen_flags: <defaults>
</compile_context>

<pallas_src>
import functools

import jax
import jax.numpy as jnp
from jax.experimental import pallas as pl
from jax.experimental.pallas import tpu as pltpu

HIDDEN = 64


# -----------------------------------------------------------------------------
# Fused kernel:
#   ew   = relu(edge_attr @ W_emb + b_emb)                 (edge embedding)
#   A    = D^-1/2 (Adj + I) D^-1/2  (dense PyG gcn_norm, built via one-hots)
#   h    = relu((A @ x) @ W1 + b1)                          (conv1 + relu)
#   h2   = (A @ h) @ W2 + b2                                (conv2)
#   out  = (wl^T h2^T) pool^T + bl                          (Linear + add-pool,
#                                                            reassociated, [1,G])
# -----------------------------------------------------------------------------
def fused_gcn_kernel(idx_ref, ea_ref, x_ref, w12_ref, par_ref, o_ref):
    n, c = x_ref.shape
    e = ea_ref.shape[0]
    hidden = w12_ref.shape[1]
    g = o_ref.shape[1]

    # --- packed params (static ref slices). ---------------------------------
    b1 = par_ref[0:1, 0:hidden]       # [1, H]
    b2 = par_ref[1:2, 0:hidden]       # [1, H]
    wl_row = par_ref[2:3, 0:hidden]   # [1, H]   (wl[:, 0] as a lane row)
    w_emb = par_ref[3:4, 0:3]         # [1, 3]
    b_emb = par_ref[4:5, 0:1]         # [1, 1]
    bl = par_ref[5:6, 0:1]            # [1, 1]

    src_row = idx_ref[0:1, 0:e]       # [1, E]
    dst_row = idx_ref[1:2, 0:e]       # [1, E]
    bat_row = idx_ref[2:3, 0:n]       # [1, N]

    # --- edge-weight embedding as a lane row: [1,3] x [E,3]^T -> [1,E] (MXU,
    #     transposed RHS is native; no transposes anywhere). -------------------
    ew = jax.lax.dot_general(w_emb, ea_ref[...],
                             (((1,), (1,)), ((), ())),
                             preferred_element_type=jnp.float32)
    ew = jnp.maximum(ew + b_emb, 0.0)                                   # [1, E]

    # --- one-hot incidence + GCN symmetric normalization; self-loop (weight 1)
    #     folded analytically: deg += 1 and A += eye * (1/deg). ---------------
    node_iota = jax.lax.broadcasted_iota(jnp.int32, (n, e), 0)          # [N, E]
    onehot_src = (node_iota == src_row).astype(jnp.float32)             # [N, E]
    onehot_dst = (node_iota == dst_row).astype(jnp.float32)             # [N, E]

    deg = jnp.sum(onehot_dst * ew, axis=-1, keepdims=True) + 1.0        # [N, 1]
    dinv = jax.lax.rsqrt(deg)                                           # [N, 1]
    dinv_src = jnp.sum(dinv * onehot_src, axis=0, keepdims=True)        # [1, E]
    dinv_dst = jnp.sum(dinv * onehot_dst, axis=0, keepdims=True)        # [1, E]
    norm = dinv_src * ew * dinv_dst                                     # [1, E]

    row_i = jax.lax.broadcasted_iota(jnp.int32, (n, n), 0)
    col_i = jax.lax.broadcasted_iota(jnp.int32, (n, n), 1)
    eye = (row_i == col_i).astype(jnp.float32)
    # A[d, s] = sum_e (onehot_dst * norm)[d, e] * onehot_src[s, e]  (contract E)
    a = jax.lax.dot_general(onehot_dst * norm, onehot_src,
                            (((1,), (1,)), ((), ())),
                            preferred_element_type=jnp.float32)
    a = a + eye * (dinv * dinv)                                         # [N, N]

    # --- conv1 + relu, reassociated as (A @ x) @ W1 (in_channels < hidden). --
    w1 = w12_ref[0:c, :]
    w2 = w12_ref[c:c + hidden, :]
    ax = jnp.dot(a, x_ref[...], preferred_element_type=jnp.float32)
    h = jnp.dot(ax, w1, preferred_element_type=jnp.float32) + b1
    h = jnp.maximum(h, 0.0)

    # --- conv2. ---------------------------------------------------------------
    ah = jnp.dot(a, h, preferred_element_type=jnp.float32)
    h2 = jnp.dot(ah, w2, preferred_element_type=jnp.float32) + b2       # [N, H]

    # --- Linear(H, 1) then global_add_pool, reassociated & lane-dense:
    #     v = wl^T h2^T  -> [1, N];  out = v pool^T -> [1, G]. ----------------
    v_row = jax.lax.dot_general(wl_row, h2, (((1,), (1,)), ((), ())),
                                preferred_element_type=jnp.float32)     # [1, N]
    graph_iota = jax.lax.broadcasted_iota(jnp.int32, (g, n), 0)
    pool = (graph_iota == bat_row).astype(jnp.float32)                  # [G, N]
    out = jax.lax.dot_general(v_row, pool, (((1,), (1,)), ((), ())),
                              preferred_element_type=jnp.float32)       # [1, G]
    o_ref[...] = out + bl


# -----------------------------------------------------------------------------
# One-time parameter packing (done at param-prep time, NOT per call).
# -----------------------------------------------------------------------------
def pack_params(params):
    hidden = params["w1"].shape[1]
    assert hidden <= 128, "param slab packs biases/wl along 128 lanes"
    assert params["wl"].shape[1] == 1, "forward() squeezes dim 1"
    par = jnp.zeros((8, 128), jnp.float32)
    par = par.at[0, :hidden].set(params["b1"])
    par = par.at[1, :hidden].set(params["b2"])
    par = par.at[2, :hidden].set(params["wl"][:, 0])
    par = par.at[3, 0:3].set(params["w_emb"][:, 0])
    par = par.at[4, 0].set(params["b_emb"][0])
    par = par.at[5, 0].set(params["bl"][0])
    w12 = jnp.concatenate([params["w1"], params["w2"]], axis=0)   # [C+H, H]
    return {"par": par, "w12": w12.astype(jnp.float32)}


@functools.partial(jax.jit, static_argnames=("num_graphs",))
def gcn_forward(packed, x, edge_index, edge_attr, batch, num_graphs):
    n = x.shape[0]
    e = edge_index.shape[1]
    em = max(e, n)

    # Per-call int32 index slab [3, max(E,N)]: rows = src, dst, batch
    # (one tiny fused pad/stack; padding value -1 never matches any index).
    def _pad(v):
        return jnp.pad(v.astype(jnp.int32), (0, em - v.shape[0]),
                       constant_values=-1)

    idx_slab = jnp.stack([_pad(edge_index[0]), _pad(edge_index[1]), _pad(batch)])

    vmem = pl.BlockSpec(memory_space=pltpu.MemorySpace.VMEM)
    out = pl.pallas_call(
        fused_gcn_kernel,
        out_shape=jax.ShapeDtypeStruct((1, num_graphs), jnp.float32),
        in_specs=[vmem] * 5,
        out_specs=vmem,
    )(idx_slab, edge_attr.astype(jnp.float32), x.astype(jnp.float32),
      packed["w12"], packed["par"])
    return out[0]   # [num_graphs]  — matches .squeeze(1)


# -----------------------------------------------------------------------------
# Pure-JAX reference (same math as PyG gcn_norm + dense propagate) for checking.
# -----------------------------------------------------------------------------
def build_norm_adj(edge_index, edge_weight, num_nodes):
    row, col = edge_index[0], edge_index[1]            # row = src, col = dst
    loop = jnp.arange(num_nodes, dtype=edge_index.dtype)
    row = jnp.concatenate([row, loop])
    col = jnp.concatenate([col, loop])
    ew = jnp.concatenate([edge_weight, jnp.ones((num_nodes,), jnp.float32)])
    deg = jnp.zeros((num_nodes,), jnp.float32).at[col].add(ew)
    dinv = jnp.where(deg > 0, 1.0 / jnp.sqrt(deg), 0.0)
    norm = dinv[row] * ew * dinv[col]
    return jnp.zeros((num_nodes, num_nodes), jnp.float32).at[col, row].add(norm)


def reference_forward(params, x, edge_index, edge_attr, batch, num_graphs):
    ew = jax.nn.relu(edge_attr @ params["w_emb"] + params["b_emb"])[:, 0]
    a_norm = build_norm_adj(edge_index, ew, x.shape[0])
    h = jax.nn.relu(a_norm @ (x @ params["w1"]) + params["b1"])
    h = a_norm @ (h @ params["w2"]) + params["b2"]
    pool_mat = (batch[None, :] == jnp.arange(num_graphs)[:, None]).astype(jnp.float32)
    pooled = pool_mat @ h
    return (pooled @ params["wl"] + params["bl"]).squeeze(1)


if __name__ == "__main__":
    key = jax.random.PRNGKey(0)
    in_channels, out_channels = 8, 1
    num_nodes, num_edges, num_graphs = 16, 32, 2

    keys = jax.random.split(key, 12)
    x = jax.random.normal(keys[0], (num_nodes, in_channels), jnp.float32)
    edge_attr = jax.random.normal(keys[1], (num_edges, 3), jnp.float32)
    # random directed edges, kept within each graph's node range
    src0 = jax.random.randint(keys[2], (num_edges // 2,), 0, num_nodes // 2)
    dst0 = jax.random.randint(keys[3], (num_edges // 2,), 0, num_nodes // 2)
    src1 = jax.random.randint(keys[4], (num_edges // 2,), num_nodes // 2, num_nodes)
    dst1 = jax.random.randint(keys[5], (num_edges // 2,), num_nodes // 2, num_nodes)
    edge_index = jnp.stack([jnp.concatenate([src0, src1]),
                            jnp.concatenate([dst0, dst1])]).astype(jnp.int32)
    batch = jnp.concatenate([jnp.zeros((num_nodes // 2,), jnp.int32),
                             jnp.ones((num_nodes // 2,), jnp.int32)])

    params = {
        "w_emb": jax.random.normal(keys[6], (3, 1), jnp.float32) * 0.5,
        "b_emb": jax.random.normal(keys[7], (1,), jnp.float32) * 0.1,
        "w1": jax.random.normal(keys[8], (in_channels, HIDDEN), jnp.float32) * 0.2,
        "b1": jnp.zeros((HIDDEN,), jnp.float32),
        "w2": jax.random.normal(keys[9], (HIDDEN, HIDDEN), jnp.float32) * 0.1,
        "b2": jnp.zeros((HIDDEN,), jnp.float32),
        "wl": jax.random.normal(keys[10], (HIDDEN, out_channels), jnp.float32) * 0.1,
        "bl": jax.random.normal(keys[11], (out_channels,), jnp.float32) * 0.1,
    }

    packed = pack_params(params)   # one-time packing (no per-call transposes)

    out = jax.block_until_ready(
        gcn_forward(packed, x, edge_index, edge_attr, batch,
                    num_graphs=num_graphs))
    ref = jax.block_until_ready(
        reference_forward(params, x, edge_index, edge_attr, batch, num_graphs))

    assert out.shape == (num_graphs,), out.shape
    assert jnp.allclose(out, ref, atol=1e-4, rtol=1e-4), (out, ref)
    print("KERNEL_OK")
</pallas_src>

<mosaic_0001>
module attributes {stable_mosaic.version = 11 : i64} {
  func.func @fused_gcn_kernel(%arg0: memref<3x32xi32, #tpu.memory_space<vmem>>, %arg1: memref<32x3xf32, #tpu.memory_space<vmem>>, %arg2: memref<16x8xf32, #tpu.memory_space<vmem>>, %arg3: memref<72x64xf32, #tpu.memory_space<vmem>>, %arg4: memref<8x128xf32, #tpu.memory_space<vmem>>, %arg5: memref<1x2xf32, #tpu.memory_space<vmem>>) attributes {dimension_semantics = [], scalar_prefetch = 0 : i64, scratch_operands = 0 : i64, tpu.core_type = #tpu.core_type<tc>} {
    %c0 = arith.constant 0 : index
    %c0_0 = arith.constant 0 : index
    %0 = vector.load %arg4[%c0, %c0_0] : memref<8x128xf32, #tpu.memory_space<vmem>>, vector<1x64xf32>
    %c1 = arith.constant 1 : index
    %c0_1 = arith.constant 0 : index
    %1 = vector.load %arg4[%c1, %c0_1] : memref<8x128xf32, #tpu.memory_space<vmem>>, vector<1x64xf32>
    %c2 = arith.constant 2 : index
    %c0_2 = arith.constant 0 : index
    %2 = vector.load %arg4[%c2, %c0_2] : memref<8x128xf32, #tpu.memory_space<vmem>>, vector<1x64xf32>
    %c3 = arith.constant 3 : index
    %c0_3 = arith.constant 0 : index
    %3 = vector.load %arg4[%c3, %c0_3] : memref<8x128xf32, #tpu.memory_space<vmem>>, vector<1x3xf32>
    %c4 = arith.constant 4 : index
    %c0_4 = arith.constant 0 : index
    %4 = vector.load %arg4[%c4, %c0_4] : memref<8x128xf32, #tpu.memory_space<vmem>>, vector<1x1xf32>
    %c5 = arith.constant 5 : index
    %c0_5 = arith.constant 0 : index
    %5 = vector.load %arg4[%c5, %c0_5] : memref<8x128xf32, #tpu.memory_space<vmem>>, vector<1x1xf32>
    %c0_6 = arith.constant 0 : index
    %c0_7 = arith.constant 0 : index
    %6 = vector.load %arg0[%c0_6, %c0_7] : memref<3x32xi32, #tpu.memory_space<vmem>>, vector<1x32xi32>
    %c1_8 = arith.constant 1 : index
    %c0_9 = arith.constant 0 : index
    %7 = vector.load %arg0[%c1_8, %c0_9] : memref<3x32xi32, #tpu.memory_space<vmem>>, vector<1x32xi32>
    %c2_10 = arith.constant 2 : index
    %c0_11 = arith.constant 0 : index
    %8 = vector.load %arg0[%c2_10, %c0_11] : memref<3x32xi32, #tpu.memory_space<vmem>>, vector<1x16xi32>
    %c0_12 = arith.constant 0 : index
    %c0_13 = arith.constant 0 : index
    %9 = vector.load %arg1[%c0_12, %c0_13] : memref<32x3xf32, #tpu.memory_space<vmem>>, vector<32x3xf32>
    %cst = arith.constant dense<0.000000e+00> : vector<1x32xf32>
    %10 = tpu.matmul %3, %9, %cst {dimension_numbers = #tpu.dot_dimension_numbers<[1], [1], [0], [0], [0, 0, 1, 0], [], []>} : vector<1x3xf32>, vector<32x3xf32>, vector<1x32xf32> -> vector<1x32xf32>
    %11 = vector.broadcast %4 : vector<1x1xf32> to vector<1x32xf32>
    %12 = arith.addf %10, %11 : vector<1x32xf32>
    %cst_14 = arith.constant 0.000000e+00 : f32
    %13 = vector.broadcast %cst_14 : f32 to vector<1x32xf32>
    %14 = arith.maximumf %12, %13 : vector<1x32xf32>
    %15 = tpu.iota {dimensions = array<i32: 0>} : vector<16x32xi32>
    %16 = vector.broadcast %6 : vector<1x32xi32> to vector<16x32xi32>
    %17 = arith.cmpi eq, %15, %16 : vector<16x32xi32>
    %18 = arith.extui %17 : vector<16x32xi1> to vector<16x32xi32>
    %19 = arith.sitofp %18 : vector<16x32xi32> to vector<16x32xf32>
    %20 = vector.broadcast %7 : vector<1x32xi32> to vector<16x32xi32>
    %21 = arith.cmpi eq, %15, %20 : vector<16x32xi32>
    %22 = arith.extui %21 : vector<16x32xi1> to vector<16x32xi32>
    %23 = arith.sitofp %22 : vector<16x32xi32> to vector<16x32xf32>
    %24 = vector.broadcast %14 : vector<1x32xf32> to vector<16x32xf32>
    %25 = arith.mulf %23, %24 : vector<16x32xf32>
    %cst_15 = arith.constant dense<0.000000e+00> : vector<16xf32>
    %26 = vector.multi_reduction <add>, %25, %cst_15 [1] : vector<16x32xf32> to vector<16xf32>
    %27 = vector.shape_cast %26 : vector<16xf32> to vector<16x1xf32>
    %cst_16 = arith.constant 1.000000e+00 : f32
    %28 = vector.broadcast %cst_16 : f32 to vector<16x1xf32>
    %29 = arith.addf %27, %28 : vector<16x1xf32>
    %30 = math.rsqrt %29 : vector<16x1xf32>
    %31 = vector.broadcast %30 : vector<16x1xf32> to vector<16x32xf32>
    %32 = arith.mulf %31, %19 : vector<16x32xf32>
    %cst_17 = arith.constant dense<0.000000e+00> : vector<32xf32>
    %33 = vector.multi_reduction <add>, %32, %cst_17 [0] : vector<16x32xf32> to vector<32xf32>
    %34 = vector.shape_cast %33 : vector<32xf32> to vector<1x32xf32>
    %35 = vector.broadcast %30 : vector<16x1xf32> to vector<16x32xf32>
    %36 = arith.mulf %35, %23 : vector<16x32xf32>
    %cst_18 = arith.constant dense<0.000000e+00> : vector<32xf32>
    %37 = vector.multi_reduction <add>, %36, %cst_18 [0] : vector<16x32xf32> to vector<32xf32>
    %38 = vector.shape_cast %37 : vector<32xf32> to vector<1x32xf32>
    %39 = arith.mulf %34, %14 : vector<1x32xf32>
    %40 = arith.mulf %39, %38 : vector<1x32xf32>
    %41 = tpu.iota {dimensions = array<i32: 0>} : vector<16x16xi32>
    %42 = tpu.iota {dimensions = array<i32: 1>} : vector<16x16xi32>
    %43 = arith.cmpi eq, %41, %42 : vector<16x16xi32>
    %44 = arith.extui %43 : vector<16x16xi1> to vector<16x16xi32>
    %45 = arith.sitofp %44 : vector<16x16xi32> to vector<16x16xf32>
    %46 = vector.broadcast %40 : vector<1x32xf32> to vector<16x32xf32>
    %47 = arith.mulf %23, %46 : vector<16x32xf32>
    %cst_19 = arith.constant dense<0.000000e+00> : vector<16x16xf32>
    %48 = tpu.matmul %47, %19, %cst_19 {dimension_numbers = #tpu.dot_dimension_numbers<[1], [1], [0], [0], [0, 0, 1, 0], [], []>} : vector<16x32xf32>, vector<16x32xf32>, vector<16x16xf32> -> vector<16x16xf32>
    %49 = arith.mulf %30, %30 : vector<16x1xf32>
    %50 = vector.broadcast %49 : vector<16x1xf32> to vector<16x16xf32>
    %51 = arith.mulf %45, %50 : vector<16x16xf32>
    %52 = arith.addf %48, %51 : vector<16x16xf32>
    %c0_20 = arith.constant 0 : index
    %c0_21 = arith.constant 0 : index
    %53 = vector.load %arg3[%c0_20, %c0_21] : memref<72x64xf32, #tpu.memory_space<vmem>>, vector<8x64xf32>
    %c8 = arith.constant 8 : index
    %c0_22 = arith.constant 0 : index
    %54 = vector.load %arg3[%c8, %c0_22] : memref<72x64xf32, #tpu.memory_space<vmem>>, vector<64x64xf32>
    %c0_23 = arith.constant 0 : index
    %c0_24 = arith.constant 0 : index
    %55 = vector.load %arg2[%c0_23, %c0_24] : memref<16x8xf32, #tpu.memory_space<vmem>>, vector<16x8xf32>
    %cst_25 = arith.constant dense<0.000000e+00> : vector<16x8xf32>
    %56 = tpu.matmul %52, %55, %cst_25 {dimension_numbers = #tpu.dot_dimension_numbers<[1], [0], [0], [1], [0, 0, 1, 1], [], []>} : vector<16x16xf32>, vector<16x8xf32>, vector<16x8xf32> -> vector<16x8xf32>
    %cst_26 = arith.constant dense<0.000000e+00> : vector<16x64xf32>
    %57 = tpu.matmul %56, %53, %cst_26 {dimension_numbers = #tpu.dot_dimension_numbers<[1], [0], [0], [1], [0, 0, 1, 1], [], []>} : vector<16x8xf32>, vector<8x64xf32>, vector<16x64xf32> -> vector<16x64xf32>
    %58 = vector.broadcast %0 : vector<1x64xf32> to vector<16x64xf32>
    %59 = arith.addf %57, %58 : vector<16x64xf32>
    %cst_27 = arith.constant 0.000000e+00 : f32
    %60 = vector.broadcast %cst_27 : f32 to vector<16x64xf32>
    %61 = arith.maximumf %59, %60 : vector<16x64xf32>
    %cst_28 = arith.constant dense<0.000000e+00> : vector<16x64xf32>
    %62 = tpu.matmul %52, %61, %cst_28 {dimension_numbers = #tpu.dot_dimension_numbers<[1], [0], [0], [1], [0, 0, 1, 1], [], []>} : vector<16x16xf32>, vector<16x64xf32>, vector<16x64xf32> -> vector<16x64xf32>
    %cst_29 = arith.constant dense<0.000000e+00> : vector<16x64xf32>
    %63 = tpu.matmul %62, %54, %cst_29 {dimension_numbers = #tpu.dot_dimension_numbers<[1], [0], [0], [1], [0, 0, 1, 1], [], []>} : vector<16x64xf32>, vector<64x64xf32>, vector<16x64xf32> -> vector<16x64xf32>
    %64 = vector.broadcast %1 : vector<1x64xf32> to vector<16x64xf32>
    %65 = arith.addf %63, %64 : vector<16x64xf32>
    %cst_30 = arith.constant dense<0.000000e+00> : vector<1x16xf32>
    %66 = tpu.matmul %2, %65, %cst_30 {dimension_numbers = #tpu.dot_dimension_numbers<[1], [1], [0], [0], [0, 0, 1, 0], [], []>} : vector<1x64xf32>, vector<16x64xf32>, vector<1x16xf32> -> vector<1x16xf32>
    %67 = tpu.iota {dimensions = array<i32: 0>} : vector<2x16xi32>
    %68 = vector.broadcast %8 : vector<1x16xi32> to vector<2x16xi32>
    %69 = arith.cmpi eq, %67, %68 : vector<2x16xi32>
    %70 = arith.extui %69 : vector<2x16xi1> to vector<2x16xi32>
    %71 = arith.sitofp %70 : vector<2x16xi32> to vector<2x16xf32>
    %cst_31 = arith.constant dense<0.000000e+00> : vector<1x2xf32>
    %72 = tpu.matmul %66, %71, %cst_31 {dimension_numbers = #tpu.dot_dimension_numbers<[1], [1], [0], [0], [0, 0, 1, 0], [], []>} : vector<1x16xf32>, vector<2x16xf32>, vector<1x2xf32> -> vector<1x2xf32>
    %73 = vector.broadcast %5 : vector<1x1xf32> to vector<1x2xf32>
    %74 = arith.addf %72, %73 : vector<1x2xf32>
    %c0_32 = arith.constant 0 : index
    %c0_33 = arith.constant 0 : index
    %75 = vector.load %arg5[%c0_32, %c0_33] : memref<1x2xf32, #tpu.memory_space<vmem>>, vector<1x2xf32>
    tpu.vector_store %arg5[%c0_32, %c0_33], %74 {strides = array<i32>} : memref<1x2xf32, #tpu.memory_space<vmem>>, vector<1x2xf32>,
    return
  }
}

</mosaic_0001>

<bundles_post_ra>
// kernel: gcn_forward.1
= control target key start
LH: loop header
LB: loop body
LE: loop exit
PB: predicated region body
PF: predicated region fallthrough
CT: control target
= control target key end

     0   :  { %vm39_vm0 = vcmask 23552   ;;  %v989_v1 = vmov 0.0   ;;  %vm990_vm1 = vmmov 0   ;;  %v991_v3 = vmov 0   ;;  %s1161_s0 = inlined_call_operand.vmem [shape: s32[3,32], index: 0, kind: input, shape index: {}]   ;;  %s1162_s1 = inlined_call_operand.vmem [shape: f32[32,3], index: 1, kind: input, shape index: {}]   ;;  %s1163_s2 = inlined_call_operand.vmem [shape: f32[16,8], index: 2, kind: input, shape index: {}]   ;;  %s1164_s3 = inlined_call_operand.vmem [shape: f32[72,64], index: 3, kind: input, shape index: {}]   ;;  %s1165_s4 = inlined_call_operand.vmem [shape: f32[8,128], index: 4, kind: input, shape index: {}]   ;;  %s1166_s5 = inlined_call_operand.hbm [shape: f32[1,2], index: 5, kind: output, shape index: {}]  }
   0x1   :  { %v33_v0 = vld [vmem:[%s1162_s1 + $0x18] sm:$0xff]  ;;  %889 = vmatprep.subr.mxu0 %v989_v1  ;;  %897 = vmatprep.mubr.msk.f32.mxu0 %vm990_vm1, %v989_v1  ;;  %v25_v2 = vld [vmem:[%s1165_s4 + $0x4] sm:$0x1] }
   0x2   :  { %890 = vmatpush3.xpose.msk.msra.mxu0 %vm39_vm0, %v33_v0  ;;  %961 = vset.pattern.permute.xlu0 %v991_v3 }
   0x3   :  { %10 = vsyncpa [#allocation3], 0  ;;  %891 = vmatprep.subr.mxu0 %v989_v1  ;;  %v32_v4 = vld [vmem:[%s1162_s1 + $0x10] sm:$0xff]  ;;  %36 = vperm.xlu0 %961, %v25_v2   ;;  %v31_v5 = vld [vmem:[%s1162_s1 + $0x8] sm:$0xff]  ;;  %v126_v8 = vlaneseq  ;;  %vm155_vm4 = vcmask 261120   ;;  %vm306_vm9 = vcmask 130048  }
   0x4   :  { %962 = vset.pattern.permute.xlu1 %v991_v3  ;;  %v30_v6 = vld [vmem:[%s1162_s1] sm:$0xff]  ;;  %v305_v61 = vld [vmem:[%s1163_s2 + $0x8] sm:$0xff]  ;;  %vm392_vm10 = vcmask 64512   ;;  %vm555_vm11 = vcmask 523264   ;;  %s992_s11 = smov [#allocation2]   ;;  %vm804_vm13 = vcmask 8192  }
   0x5   :  { %v24_v7 = vld [vmem:[%s1165_s4 + $0x3] sm:$0x1]  ;;  %v1053_v9 = vshrl.u32 %v126_v8, 7  ;;  %v828_v12 = vld [vmem:[%s1161_s0 + $0x1] ss:$0 sm:$0xff]  ;;  %v191_v63 = vand.u32 127, %v126_v8 }
   0x6   :  { %892 = vmatpush3.xpose.msk.msra.mxu0 %vm39_vm0, %v32_v4  ;;  %v825_v25 = vld [vmem:[%s1161_s0] ss:$0 sm:$0xff] }
   0x7   :  { %893 = vmatprep.subr.mxu0 %v989_v1  ;;  %v1056_v10 = vadd.s32 8, %v1053_v9  ;;  %v151_v15 = vsub.s32 0, %v1053_v9  ;;  %vm143_vm3 = vcmp.eq.s32.totalorder %v1053_v9, %v828_v12  ;;  %vm133_vm6 = vcmp.eq.s32.totalorder %v1053_v9, %v825_v25  ;;  %v304_v62 = vld [vmem:[%s1163_s2] sm:$0xff]  ;;  %s812_s2 = sshll.u32 %s992_s11, 4  ;;  %s813_s2 = int_to_ptr.vmem [resolvable:$true] %s812_s2 }
   0x8   :  { %v829_v19 = vsel %vm143_vm3, 1.0, %v989_v1  ;;  %v826_v27 = vsel %vm133_vm6, 1.0, %v989_v1  ;;  %vm192_vm7 = vcmp.eq.s32.totalorder %v1053_v9, %v191_v63  ;;  %v295_v8 = vld [vmem:[%s1164_s3] sm:$0xff]  ;;  %s967_s12 = scalar_lea.vmem %s813_s2, 16  ;;  %s971_s13 = scalar_lea.vmem %s813_s2, 32 }
   0x9   :  { %vm144_vm2 = vcmp.eq.s32.totalorder %v1056_v10, %v828_v12  ;;  %vm134_vm5 = vcmp.eq.s32.totalorder %v1056_v10, %v825_v25  ;;  %vm193_vm8 = vcmp.eq.s32.totalorder %v1056_v10, %v191_v63  ;;  %v831_v3 = vsel %vm192_vm7, 1.0, %v989_v1  ;;  %p968_p0 = scmp.ne.s32.totalorder %s813_s2, %s967_s12  ;;  %p972_p1 = scmp.lt.s32.totalorder %s813_s2, %s813_s2 }
   0xa   :  { %894 = vmatpush3.xpose.msk.msra.mxu0 %vm39_vm0, %v31_v5  ;;  %v830_v18 = vsel %vm144_vm2, 1.0, %v989_v1  ;;  %v827_v26 = vsel %vm134_vm5, 1.0, %v989_v1  ;;  %v832_v4 = vsel %vm193_vm8, 1.0, %v989_v1  ;;  %p973_p2 = scmp.lt.s32.totalorder %s971_s13, %s967_s12 }
   0xb   :  { %895 = vmatprep.subr.mxu0 %v989_v1  ;;  %900 = vmatprep.subr.msk.mxu1 %vm155_vm4, %v827_v26 }
   0xc   :  { %901 = vmatpush3.xpose.msk.msra.mxu1 %vm155_vm4, %v827_v26  ;;  %p974_p3 = por %p973_p2, %p972_p1 }
   0xd   :  { %902 = vmatprep.subr.msk.mxu1 %vm155_vm4, %v826_v27 }
   0xe   :  { %896 = vmatpush3.xpose.msk.msra.mxu0 %vm39_vm0, %v30_v6  ;;  %p975_p4 = pnand %p974_p3, %p968_p0 }
  0x10   :  { %903 = vmatpush3.xpose.msk.msra.mxu1 %vm155_vm4, %v826_v27 }
  0x11   :  { %898 = vmatmul.mubr.msk.f32.vlgmr.msra.gmra.mxu0 %vm39_vm0, %v24_v7  ;;  %907 = vmatprep.subr.mxu1 %v305_v61 }
  0x7e   :  { %v37_v11 = vpop.permute.xlu0 %36 }
  0xd1   :  { %v121_v13 = vpop.f32.mrf.mxu0 }
  0xd2   :  { %v122_v14 = vadd.f32 %v121_v13, %v37_v11 }
  0xd3   :  { %v899_v16 = vpop.f32.mrf.mxu0 }
  0xd4   :  { %v125_v17 = vmax.f32 %v122_v14, 0.0  ;;  %v302_v16 = vld [vmem:[%s1164_s3 + $0x38] sm:$0xff] }
  0xd6   :  { %v152_v20 = vrot.slane %v125_v17, %v151_v15 }
  0xd8   :  { %v154_v21 = vmul.f32 %v830_v18, %v152_v20  ;;  %v153_v22 = vmul.f32 %v829_v19, %v152_v20  ;;  %v298_v20 = vld [vmem:[%s1164_s3 + $0x18] sm:$0xff] }
  0xda   :  { %v159_v23 = vsel %vm155_vm4, %v154_v21, 0.0  ;;  %v156_v24 = vsel %vm155_vm4, %v153_v22, 0.0  ;;  %v839_v21 = vld [vmem:[%s1165_s4] ss:$0 sm:$0xff] }
  0xdb   :  { %160 = vadd.xlane.f32.xlu1 %v159_v23  ;;  %157 = vadd.xlane.f32.xlu0 %v156_v24 }
 0x164   :  { %v161_v28 = vpop.xlane.xlu1 %160  ;;  %v158_v29 = vpop.xlane.xlu0 %157 }
 0x165   :  { %v163_v30 = vadd.f32 1.0, %v161_v28  ;;  %v162_v31 = vadd.f32 1.0, %v158_v29  ;;  %v297_v28 = vld [vmem:[%s1164_s3 + $0x10] sm:$0xff]  ;;  %v296_v29 = vld [vmem:[%s1164_s3 + $0x8] sm:$0xff] }
 0x167   :  { %963 = vrsqrt.f32 %v163_v30 }
 0x168   :  { %965 = vrsqrt.f32 %v162_v31 }
 0x174   :  { %v964_v32 = vpop.eup %963 }
 0x175   :  { %v966_v33 = vpop.eup %965  ;;  %v167_v34 = vmul.f32 %v964_v32, %v827_v26  ;;  %v178_v35 = vmul.f32 %v964_v32, %v830_v18  ;;  %v205_v2 = vmul.f32 %v964_v32, %v964_v32  ;;  %v844_v32 = vld [vmem:[%s1165_s4 + $0x1] ss:$0 sm:$0xff] }
 0x176   :  { %v166_v36 = vmul.f32 %v966_v33, %v826_v27  ;;  %v177_v37 = vmul.f32 %v966_v33, %v829_v19  ;;  %v204_v0 = vmul.f32 %v966_v33, %v966_v33 }
 0x177   :  { %v169_v38 = vsel %vm155_vm4, %v167_v34, 0.0  ;;  %v180_v39 = vsel %vm155_vm4, %v178_v35, 0.0  ;;  %v207_v7 = vmul.f32 %v832_v4, %v205_v2 }
 0x178   :  { %v168_v40 = vsel %vm155_vm4, %v166_v36, 0.0  ;;  %v179_v41 = vsel %vm155_vm4, %v177_v37, 0.0  ;;  %v206_v6 = vmul.f32 %v831_v3, %v204_v0  ;;  %v850_v36 = vld [vmem:[%s1161_s0 + $0x2] ss:$0 sm:$0xff] }
 0x179   :  { %v170_v42 = vadd.f32 %v169_v38, %v168_v40  ;;  %v181_v43 = vadd.f32 %v180_v39, %v179_v41  ;;  %vm720_vm12 = vcmp.eq.s32.totalorder %v1053_v9, %v850_v36  ;;  %v23_v38 = vld [vmem:[%s1165_s4 + $0x2] sm:$0x1]  ;;  %v26_v9 = vld [vmem:[%s1165_s4 + $0x5] sm:$0x1] }
 0x17a   :  { %v851_v39 = vsel %vm720_vm12, 1.0, %v989_v1  ;;  %725 = vperm.xlu1 %962, %v26_v9  }
 0x17b   :  { %v171_v44 = vrot.slane %v170_v42, 4  ;;  %v182_v45 = vrot.slane %v181_v43, 4 }
 0x17d   :  { %v172_v46 = vadd.f32 %v171_v44, %v170_v42  ;;  %v183_v47 = vadd.f32 %v182_v45, %v181_v43 }
 0x17f   :  { %v173_v48 = vrot.slane %v172_v46, 2  ;;  %v184_v49 = vrot.slane %v183_v47, 2 }
 0x181   :  { %v174_v50 = vadd.f32 %v173_v48, %v172_v46  ;;  %v185_v51 = vadd.f32 %v184_v49, %v183_v47 }
 0x183   :  { %v175_v52 = vrot.slane %v174_v50, 1  ;;  %v186_v53 = vrot.slane %v185_v51, 1 }
 0x185   :  { %v176_v54 = vadd.f32 %v175_v52, %v174_v50  ;;  %v187_v55 = vadd.f32 %v186_v53, %v185_v51 }
 0x187   :  { %v188_v56 = vmul.f32 %v176_v54, %v125_v17  ;;  %v301_v17 = vld [vmem:[%s1164_s3 + $0x30] sm:$0xff] }
 0x189   :  { %v189_v57 = vmul.f32 %v188_v56, %v187_v55 }
 0x18b   :  { %v201_v58 = vrot.slane %v189_v57, %v151_v15  ;;  %v303_v15 = vld [vmem:[%s1164_s3 + $0x40] sm:$0xff] }
 0x18d   :  { %v202_v59 = vmul.f32 %v829_v19, %v201_v58  ;;  %v203_v60 = vmul.f32 %v830_v18, %v201_v58  ;;  %v300_v18 = vld [vmem:[%s1164_s3 + $0x28] sm:$0xff]  ;;  %v299_v19 = vld [vmem:[%s1164_s3 + $0x20] sm:$0xff] }
 0x18f   :  { %904 = vmatprep.mubr.msk.f32.mxu1 %vm155_vm4, %v202_v59 }
 0x190   :  { %905 = vmatmul.mubr.msk.f32.vlgmr.msra.gmra.mxu1 %vm155_vm4, %v203_v60 }
 0x191   :  { %908 = vmatpush3.msra.mxu1 %v305_v61 }
 0x192   :  { %909 = vmatprep.subr.mxu1 %v304_v62 }
 0x193   :  { %910 = vmatpush3.msra.mxu1 %v304_v62 }
 0x194   :  { %914 = vmatprep.subr.mxu1 %v295_v8 }
 0x1f5   :  { %v726_v42 = vpop.permute.xlu1 %725 }
 0x250   :  { %v906_v5 = vpop.f32.mrf.mxu1 }
 0x251   :  { %v292_v13 = vadd.f32 %v906_v5, %v207_v7 }
 0x252   :  { %v286_v11 = vpop.f32.mrf.mxu1 }
 0x253   :  { %v287_v12 = vadd.f32 %v286_v11, %v206_v6 }
 0x255   :  { %911 = vmatprep.mubr.msk.f32.mxu1 %vm306_vm9, %v287_v12  ;;  %923 = vmatprep.mubr.msk.f32.mxu0 %vm306_vm9, %v287_v12 }
 0x256   :  { %912 = vmatmul.mubr.msk.f32.vlgmr.msra.gmra.mxu1 %vm306_vm9, %v292_v13 }
 0x257   :  { %915 = vmatpush3.msra.mxu1 %v295_v8 }
 0x258   :  { %926 = vmatprep.subr.mxu1 %v303_v15 }
 0x316   :  { %v913_v10 = vpop.f32.mrf.mxu1 }
 0x318   :  { %v379_v14 = vpop.f32.mrf.mxu1 }
 0x319   :  { %916 = vmatprep.mubr.msk.f32.mxu1 %vm392_vm10, %v379_v14 }
 0x31a   :  { %917 = vmatmul.mubr.msk.f32.vlgmr.msra.gmra.mxu1 %vm392_vm10, %v913_v10 }
 0x31b   :  { %927 = vmatpush3.msra.mxu1 %v303_v15 }
 0x31c   :  { %928 = vmatprep.subr.mxu1 %v302_v16 }
 0x31d   :  { %929 = vmatpush3.msra.mxu1 %v302_v16 }
 0x31e   :  { %930 = vmatprep.subr.mxu1 %v301_v17 }
 0x31f   :  { %931 = vmatpush3.msra.mxu1 %v301_v17 }
 0x320   :  { %932 = vmatprep.subr.mxu1 %v300_v18 }
 0x321   :  { %933 = vmatpush3.msra.mxu1 %v300_v18 }
 0x322   :  { %934 = vmatprep.subr.mxu1 %v299_v19 }
 0x323   :  { %935 = vmatpush3.msra.mxu1 %v299_v19 }
 0x324   :  { %936 = vmatprep.subr.mxu1 %v298_v20 }
 0x325   :  { %937 = vmatpush3.msra.mxu1 %v298_v20 }
 0x326   :  { %938 = vmatprep.subr.mxu1 %v297_v28 }
 0x327   :  { %939 = vmatpush3.msra.mxu1 %v297_v28 }
 0x328   :  { %940 = vmatprep.subr.mxu1 %v296_v29 }
 0x329   :  { %941 = vmatpush3.msra.mxu1 %v296_v29 }
 0x3da   :  { %v918_v22 = vpop.f32.mrf.mxu1 }
 0x3db   :  { %v471_v23 = vadd.f32 %v918_v22, %v839_v21 }
 0x3dc   :  { %v465_v24 = vpop.f32.mrf.mxu1 }
 0x3dd   :  { %v475_v25 = vmax.f32 %v471_v23, 0.0  ;;  %v466_v26 = vadd.f32 %v839_v21, %v465_v24 }
 0x3df   :  { %v474_v27 = vmax.f32 %v466_v26, 0.0  ;;  %919 = vmatprep.subr.mxu0 %v475_v25 }
 0x3e0   :  { %920 = vmatpush3.msra.mxu0 %v475_v25 }
 0x3e1   :  { %921 = vmatprep.subr.mxu0 %v474_v27 }
 0x3e2   :  { %922 = vmatpush3.msra.mxu0 %v474_v27 }
 0x3e3   :  { %924 = vmatmul.mubr.msk.f32.vlgmr.msra.gmra.mxu0 %vm306_vm9, %v292_v13  ;;  %945 = vmatprep.subr.mxu0 %v989_v1 }
 0x3e4   :  { %949 = vmatprep.mubr.msk.f32.mxu0 %vm990_vm1, %v989_v1 }
 0x4a3   :  { %v925_v30 = vpop.f32.mrf.mxu0 }
 0x4a5   :  { %v542_v31 = vpop.f32.mrf.mxu0 }
 0x4a6   :  { %942 = vmatprep.mubr.msk.f32.mxu1 %vm555_vm11, %v542_v31 }
 0x4a7   :  { %943 = vmatmul.mubr.msk.f32.vlgmr.msra.gmra.mxu1 %vm555_vm11, %v925_v30 }
 0x567   :  { %v944_v33 = vpop.f32.mrf.mxu1 }
 0x568   :  { %v634_v34 = vadd.f32 %v944_v33, %v844_v32 }
 0x569   :  { %v628_v35 = vpop.f32.mrf.mxu1 }
 0x56a   :  { %946 = vmatpush3.xpose.msk.msra.mxu0 %vm555_vm11, %v634_v34  ;;  %v629_v37 = vadd.f32 %v844_v32, %v628_v35 }
 0x56b   :  { %947 = vmatprep.subr.mxu0 %v989_v1 }
 0x56e   :  { %948 = vmatpush3.xpose.msk.msra.mxu0 %vm555_vm11, %v629_v37 }
 0x56f   :  { %952 = vmatprep.subr.mxu0 %v989_v1 }
 0x571   :  { %950 = vmatmul.mubr.msk.f32.vlgmr.msra.gmra.mxu0 %vm555_vm11, %v23_v38 }
 0x572   :  { %953 = vmatpush3.xpose.msk.msra.mxu0 %vm306_vm9, %v851_v39  ;;  %954 = vmatprep.mubr.msk.f32.mxu0 %vm990_vm1, %v989_v1 }
 0x631   :  { %v712_v40 = vpop.f32.mrf.mxu0 }
 0x632   :  { %955 = vmatmul.mubr.msk.f32.vlgmr.msra.gmra.mxu0 %vm306_vm9, %v712_v40 }
 0x633   :  { %v951_v41 = vpop.f32.mrf.mxu0 }
 0x6f2   :  { %v800_v43 = vpop.f32.mrf.mxu0 }
 0x6f3   :  { %v801_v44 = vadd.f32 %v800_v43, %v726_v42 }
 0x6f4   :  { %v956_v45 = vpop.f32.mrf.mxu0 }
 0x6f5   :  { %805 = vst.msk [vmem:[#allocation2] sm:$0x1] %vm804_vm13, %v801_v44 }
 0x6f6   :  { %978 = shalt.err (!%p975_p4)
}
 0x6f7   :  { %815 = dma.vmem_to_hbm [thread:$0]  %s813_s2, 16, %s1166_s5, [#allocation3]  }
 0x6f8   :  { %987 = dma.done.wait [#allocation3], 16  }
 0x6f9   :  { %988 = vsyncadd [#allocation3], 4294967280 }
 0x6fa   :  { %819 = vsyncpa [#allocation3], 1 }

</bundles_post_ra>
